<compile_context>
chip_gen: v7x
topology: tpu7x:2x2x1
jax: 0.10.0
libtpu: 0.0.40
codegen_flags: <defaults>
</compile_context>

<pallas_src>
import jax
import jax.numpy as jnp
from jax.experimental import pallas as pl
from jax.experimental.pallas import tpu as pltpu

_LANE = 128
_SUBLANE = 8


def intent_predictor_kernel(x_ref, len_ref, v_ref, w_ref, b_ref, out_ref):
    # x_ref:   (TB, S, H)     streaming dtype (f32 default; bf16 optional)
    # len_ref: (TB, 1)        int32
    # v_ref:   (1, H)         f32   attention vector
    # w_ref:   (H, NI_pad)    f32   linear weight^T, zero-padded to 128 lanes
    # b_ref:   (1, NI_pad)    f32   linear bias, zero-padded
    # out_ref: (TB, NI_pad)   f32
    x = x_ref[...].astype(jnp.float32)                    # (TB, S, H)
    v = v_ref[...]                                        # (1, H)

    # attention logits: dot of every timestep with the attention vector
    # (VPU multiply + lane reduce; tiny next to the HBM stream of x)
    logits = jnp.sum(x * v[None, :, :], axis=-1)          # (TB, S)

    # per-row stabilized exp (shift-invariant => identical to torch's global max)
    m = jnp.max(logits, axis=-1, keepdims=True)           # (TB, 1)
    unnorm = jnp.exp(logits - m)                          # (TB, S)

    # padding mask from lengths
    lens = len_ref[...]                                   # (TB, 1) int32
    idx = jax.lax.broadcasted_iota(jnp.int32, logits.shape, 1)
    masked = jnp.where(idx < lens, unnorm, 0.0)           # (TB, S)

    # defer normalization: weighted sum with unnormalized weights, one scale per row
    denom = jnp.sum(masked, axis=1, keepdims=True)        # (TB, 1)
    rep_un = jnp.sum(x * masked[:, :, None], axis=1)      # (TB, H)  (sublane reduce)
    rep = rep_un * pl.reciprocal(denom, approx=False)     # (TB, H)

    # lane-dense intent head on the MXU (zero-padded columns, unmasked stores)
    out_ref[...] = (
        jnp.dot(rep, w_ref[...], preferred_element_type=jnp.float32) + b_ref[...]
    )


def intent_predictor(inputs, lengths, attention_vector, weight, bias,
                     *, batch_tile=None, stream_dtype=jnp.float32):
    """inputs: (B, S, H), lengths: (B,) ints, attention_vector: (H,),
    weight: (NI, H), bias: (NI,). Returns (B, NI) f32 intent logits."""
    B, S, H = inputs.shape
    NI = weight.shape[0]
    NI_pad = ((NI + _LANE - 1) // _LANE) * _LANE          # lane-dense output width

    x = inputs.astype(stream_dtype)
    itemsize = jnp.dtype(stream_dtype).itemsize

    # --- choose batch tile: keep a single x tile around ~8 MiB (Pallas double-buffers it) ---
    if batch_tile is None:
        per_row = S * H * itemsize
        batch_tile = max(_SUBLANE, min(512, (8 * 1024 * 1024) // max(per_row, 1)))
    if B <= batch_tile:
        TB = B                                            # single grid step, any B ok
    else:
        TB = max(_SUBLANE, (batch_tile // _SUBLANE) * _SUBLANE)  # sublane-aligned when tiled

    n_tiles = pl.cdiv(B, TB)
    B_pad = n_tiles * TB

    lengths_i32 = lengths.astype(jnp.int32)
    if B_pad != B:
        x = jnp.pad(x, ((0, B_pad - B), (0, 0), (0, 0)))
        # pad with length 1 so padded rows never divide by zero (rows discarded anyway)
        lengths_i32 = jnp.pad(lengths_i32, (0, B_pad - B), constant_values=1)
    lengths_2d = lengths_i32.reshape(B_pad, 1)

    v_2d = attention_vector.reshape(1, H).astype(jnp.float32)
    w_t = jnp.zeros((H, NI_pad), jnp.float32).at[:, :NI].set(weight.T.astype(jnp.float32))
    b_2d = jnp.zeros((1, NI_pad), jnp.float32).at[:, :NI].set(bias.astype(jnp.float32))

    x_tile_bytes = TB * S * H * itemsize
    vmem_limit = int(min(64 * 1024 * 1024, max(32 * 1024 * 1024, 4 * x_tile_bytes)))

    cost = pl.CostEstimate(
        flops=int(4 * B_pad * S * H + 2 * B_pad * H * NI_pad),
        transcendentals=int(B_pad * S),
        bytes_accessed=int(B_pad * S * H * itemsize
                           + (H * NI_pad + NI_pad + H) * 4
                           + B_pad * NI_pad * 4),
    )

    out_padded = pl.pallas_call(
        intent_predictor_kernel,
        out_shape=jax.ShapeDtypeStruct((B_pad, NI_pad), jnp.float32),
        grid_spec=pltpu.PrefetchScalarGridSpec(
            num_scalar_prefetch=0,
            grid=(n_tiles,),
            in_specs=[
                pl.BlockSpec((TB, S, H), lambda i: (i, 0, 0)),   # streamed x tile
                pl.BlockSpec((TB, 1), lambda i: (i, 0)),         # lengths tile
                pl.BlockSpec((1, H), lambda i: (0, 0)),          # attention vector (resident)
                pl.BlockSpec((H, NI_pad), lambda i: (0, 0)),     # linear weight^T (resident)
                pl.BlockSpec((1, NI_pad), lambda i: (0, 0)),     # linear bias (resident)
            ],
            out_specs=pl.BlockSpec((TB, NI_pad), lambda i: (i, 0)),
        ),
        compiler_params=pltpu.CompilerParams(
            dimension_semantics=("parallel",),                   # megacore / v7x 2-TC split
            vmem_limit_bytes=vmem_limit,
        ),
        cost_estimate=cost,
    )(x, lengths_2d, v_2d, w_t, b_2d)

    return out_padded[:B, :NI]


def _reference(inputs, lengths, attention_vector, weight, bias):
    # mirrors the PyTorch module (global max, explicit divide)
    logits = jnp.einsum("bsh,h->bs", inputs, attention_vector)
    unnorm = jnp.exp(logits - jnp.max(logits))
    mask = (jnp.arange(inputs.shape[1])[None, :] < lengths[:, None]).astype(jnp.float32)
    masked = unnorm * mask
    attn = masked / jnp.sum(masked, axis=1, keepdims=True)
    rep = jnp.sum(inputs * attn[:, :, None], axis=1)
    return rep @ weight.T + bias


if __name__ == "__main__":
    # Small shapes consistent with the module:
    #   hidden_dim=16, bidirection=True -> attention_size = 32, num_intent = 7
    B, S, H, NI = 2, 8, 32, 7

    key = jax.random.PRNGKey(0)
    k_x, k_v, k_w, k_b, k_x2, k_l2 = jax.random.split(key, 6)

    inputs = jax.random.normal(k_x, (B, S, H), dtype=jnp.float32)
    lengths = jnp.array([8, 5], dtype=jnp.int32)

    # Attention(attention_size).attention_vector ~ Normal(0, 0.05)
    attention_vector = 0.05 * jax.random.normal(k_v, (H,), dtype=jnp.float32)
    # nn.Linear(attention_size, num_intent): weight (NI, H), bias (NI,)
    bound = 1.0 / jnp.sqrt(H)
    weight = jax.random.uniform(k_w, (NI, H), jnp.float32, -bound, bound)
    bias = jax.random.uniform(k_b, (NI,), jnp.float32, -bound, bound)

    # --- single-tile path ---
    out = intent_predictor(inputs, lengths, attention_vector, weight, bias)
    out = jax.block_until_ready(out)
    ref = _reference(inputs, lengths, attention_vector, weight, bias)
    assert out.shape == (B, NI)
    assert jnp.allclose(out, ref, atol=1e-5, rtol=1e-5), (out, ref)

    # --- gridded / padded path (exercises batch tiling with TB=8, B_pad=24) ---
    B2 = 20
    inputs2 = jax.random.normal(k_x2, (B2, S, H), dtype=jnp.float32)
    lengths2 = jax.random.randint(k_l2, (B2,), 1, S + 1, dtype=jnp.int32)
    out2 = intent_predictor(inputs2, lengths2, attention_vector, weight, bias,
                            batch_tile=8)
    out2 = jax.block_until_ready(out2)
    ref2 = _reference(inputs2, lengths2, attention_vector, weight, bias)
    assert out2.shape == (B2, NI)
    assert jnp.allclose(out2, ref2, atol=1e-5, rtol=1e-5), (out2, ref2)

    print("KERNEL_OK")
</pallas_src>

<mosaic_0001>
module attributes {stable_mosaic.version = 11 : i64} {
  func.func @intent_predictor_kernel(%arg0: i32, %arg1: memref<2x8x32xf32, #tpu.memory_space<vmem>>, %arg2: memref<2x1xi32, #tpu.memory_space<vmem>>, %arg3: memref<1x32xf32, #tpu.memory_space<vmem>>, %arg4: memref<32x128xf32, #tpu.memory_space<vmem>>, %arg5: memref<1x128xf32, #tpu.memory_space<vmem>>, %arg6: memref<2x128xf32, #tpu.memory_space<vmem>>) attributes {dimension_semantics = [#tpu.dimension_semantics<parallel>], iteration_bounds = array<i64: 1>, scalar_prefetch = 0 : i64, scratch_operands = 0 : i64, tpu.core_type = #tpu.core_type<tc>, window_params = [{transform_indices = @transform_0, window_bounds = array<i64: 2, 8, 32>}, {transform_indices = @transform_1, window_bounds = array<i64: 2, 1>}, {pipeline_mode = #tpu.pipeline_mode<synchronous>, transform_indices = @transform_2, window_bounds = array<i64: 1, 32>}, {pipeline_mode = #tpu.pipeline_mode<synchronous>, transform_indices = @transform_3, window_bounds = array<i64: 32, 128>}, {pipeline_mode = #tpu.pipeline_mode<synchronous>, transform_indices = @transform_4, window_bounds = array<i64: 1, 128>}, {transform_indices = @transform_5, window_bounds = array<i64: 2, 128>}]} {
    %c0 = arith.constant 0 : index
    %c0_0 = arith.constant 0 : index
    %c0_1 = arith.constant 0 : index
    %0 = vector.load %arg1[%c0, %c0_0, %c0_1] : memref<2x8x32xf32, #tpu.memory_space<vmem>>, vector<2x8x32xf32>
    %c0_2 = arith.constant 0 : index
    %c0_3 = arith.constant 0 : index
    %1 = vector.load %arg3[%c0_2, %c0_3] : memref<1x32xf32, #tpu.memory_space<vmem>>, vector<1x32xf32>
    %2 = vector.shape_cast %1 : vector<1x32xf32> to vector<1x1x32xf32>
    %3 = vector.broadcast %2 : vector<1x1x32xf32> to vector<2x8x32xf32>
    %4 = arith.mulf %0, %3 : vector<2x8x32xf32>
    %cst = arith.constant dense<0.000000e+00> : vector<2x8xf32>
    %5 = vector.multi_reduction <add>, %4, %cst [2] : vector<2x8x32xf32> to vector<2x8xf32>
    %cst_4 = arith.constant dense<0xFF800000> : vector<2xf32>
    %6 = vector.multi_reduction <maximumf>, %5, %cst_4 [1] : vector<2x8xf32> to vector<2xf32>
    %7 = vector.shape_cast %6 : vector<2xf32> to vector<2x1xf32>
    %8 = vector.broadcast %7 : vector<2x1xf32> to vector<2x8xf32>
    %9 = arith.subf %5, %8 : vector<2x8xf32>
    %10 = math.exp %9 : vector<2x8xf32>
    %c0_5 = arith.constant 0 : index
    %c0_6 = arith.constant 0 : index
    %11 = vector.load %arg2[%c0_5, %c0_6] : memref<2x1xi32, #tpu.memory_space<vmem>>, vector<2x1xi32>
    %12 = tpu.iota {dimensions = array<i32: 1>} : vector<2x8xi32>
    %13 = vector.broadcast %11 : vector<2x1xi32> to vector<2x8xi32>
    %14 = arith.cmpi slt, %12, %13 : vector<2x8xi32>
    %cst_7 = arith.constant 0.000000e+00 : f32
    %15 = vector.broadcast %cst_7 : f32 to vector<2x8xf32>
    %16 = arith.select %14, %10, %15 : vector<2x8xi1>, vector<2x8xf32>
    %cst_8 = arith.constant dense<0.000000e+00> : vector<2xf32>
    %17 = vector.multi_reduction <add>, %16, %cst_8 [1] : vector<2x8xf32> to vector<2xf32>
    %18 = vector.shape_cast %17 : vector<2xf32> to vector<2x1xf32>
    %19 = vector.shape_cast %16 : vector<2x8xf32> to vector<2x8x1xf32>
    %20 = vector.broadcast %19 : vector<2x8x1xf32> to vector<2x8x32xf32>
    %21 = arith.mulf %0, %20 : vector<2x8x32xf32>
    %cst_9 = arith.constant dense<0.000000e+00> : vector<2x32xf32>
    %22 = vector.multi_reduction <add>, %21, %cst_9 [1] : vector<2x8x32xf32> to vector<2x32xf32>
    %23 = tpu.reciprocal %18 : vector<2x1xf32> -> vector<2x1xf32>
    %24 = vector.broadcast %23 : vector<2x1xf32> to vector<2x32xf32>
    %25 = arith.mulf %22, %24 : vector<2x32xf32>
    %c0_10 = arith.constant 0 : index
    %c0_11 = arith.constant 0 : index
    %26 = vector.load %arg4[%c0_10, %c0_11] : memref<32x128xf32, #tpu.memory_space<vmem>>, vector<32x128xf32>
    %cst_12 = arith.constant dense<0.000000e+00> : vector<2x128xf32>
    %27 = tpu.matmul %25, %26, %cst_12 {dimension_numbers = #tpu.dot_dimension_numbers<[1], [0], [0], [1], [0, 0, 1, 1], [], []>} : vector<2x32xf32>, vector<32x128xf32>, vector<2x128xf32> -> vector<2x128xf32>
    %c0_13 = arith.constant 0 : index
    %c0_14 = arith.constant 0 : index
    %28 = vector.load %arg5[%c0_13, %c0_14] : memref<1x128xf32, #tpu.memory_space<vmem>>, vector<1x128xf32>
    %29 = vector.broadcast %28 : vector<1x128xf32> to vector<2x128xf32>
    %30 = arith.addf %27, %29 : vector<2x128xf32>
    %c0_15 = arith.constant 0 : index
    %c0_16 = arith.constant 0 : index
    %31 = vector.load %arg6[%c0_15, %c0_16] : memref<2x128xf32, #tpu.memory_space<vmem>>, vector<2x128xf32>
    tpu.vector_store %arg6[%c0_15, %c0_16], %30 {strides = array<i32>} : memref<2x128xf32, #tpu.memory_space<vmem>>, vector<2x128xf32>,
    return
  }
  func.func @transform_0(%arg0: i32) -> (i32, i32, i32) {
    %c0_i32 = arith.constant 0 : i32
    %c0_i32_0 = arith.constant 0 : i32
    %c0_i32_1 = arith.constant 0 : i32
    return %arg0, %c0_i32, %c0_i32_0 : i32, i32, i32
  }
  func.func @transform_1(%arg0: i32) -> (i32, i32) {
    %c0_i32 = arith.constant 0 : i32
    %c0_i32_0 = arith.constant 0 : i32
    return %arg0, %c0_i32 : i32, i32
  }
  func.func @transform_2(%arg0: i32) -> (i32, i32) {
    %c0_i32 = arith.constant 0 : i32
    %c0_i32_0 = arith.constant 0 : i32
    %c0_i32_1 = arith.constant 0 : i32
    return %c0_i32, %c0_i32_0 : i32, i32
  }
  func.func @transform_3(%arg0: i32) -> (i32, i32) {
    %c0_i32 = arith.constant 0 : i32
    %c0_i32_0 = arith.constant 0 : i32
    %c0_i32_1 = arith.constant 0 : i32
    return %c0_i32, %c0_i32_0 : i32, i32
  }
  func.func @transform_4(%arg0: i32) -> (i32, i32) {
    %c0_i32 = arith.constant 0 : i32
    %c0_i32_0 = arith.constant 0 : i32
    %c0_i32_1 = arith.constant 0 : i32
    return %c0_i32, %c0_i32_0 : i32, i32
  }
  func.func @transform_5(%arg0: i32) -> (i32, i32) {
    %c0_i32 = arith.constant 0 : i32
    %c0_i32_0 = arith.constant 0 : i32
    return %arg0, %c0_i32 : i32, i32
  }
}

</mosaic_0001>

<bundles_post_ra>
// kernel: tpu_custom_call.1
= control target key start
LH: loop header
LB: loop body
LE: loop exit
PB: predicated region body
PF: predicated region fallthrough
CT: control target
= control target key end

     0   :  { %10 = vsyncpa [#allocation3], 0  ;;  %s487_s0 = inlined_call_operand.hbm [shape: f32[2,8,32], index: 0, kind: input, shape index: {}]   ;;  %s488_s1 = inlined_call_operand.vmem [shape: s32[2,1], index: 1, kind: input, shape index: {}]   ;;  %s489_s2 = inlined_call_operand.vmem [shape: f32[1,32], index: 2, kind: input, shape index: {}]   ;;  %s490_s3 = inlined_call_operand.hbm [shape: f32[32,128], index: 3, kind: input, shape index: {}]   ;;  %s491_s4 = inlined_call_operand.vmem [shape: f32[1,128], index: 4, kind: input, shape index: {}]   ;;  %s492_s5 = inlined_call_operand.hbm [shape: f32[2,128], index: 5, kind: output, shape index: {}]  }
   0x1   :  { %11 = vsyncpa [#allocation6], 0 }
   0x2   :  { %12 = vsyncpa [#allocation4], 0  ;;  %s385_s18 = smov [#allocation2]   ;;  %s313_s22 = scalar_lea.hbm %s487_s0, 256 }
   0x3   :  { %s18_s19 = sshll.u32 %s385_s18, 4  ;;  %p314_p0 = scmp.ne.s32.totalorder %s487_s0, %s313_s22  ;;  %s19_s19 = int_to_ptr.vmem [resolvable:$true] %s18_s19 }
   0x4   :  { %p317_p1 = scmp.lt.u32.totalorder %s313_s22, %s487_s0 }
   0x6   :  { %p319_p2 = pnand %p317_p1, %p314_p0 }
   0x8   :  { %322 = shalt.err (!%p319_p2)
}
   0x9   :  { %s323_s27 = scalar_lea.vmem %s19_s19, 256  ;;  %p328_p4 = scmp.lt.s32.totalorder %s19_s19, %s19_s19 }
   0xa   :  { %p324_p3 = scmp.ne.s32.totalorder %s19_s19, %s323_s27  ;;  %p329_p5 = scmp.lt.s32.totalorder %s323_s27, %s323_s27 }
   0xc   :  { %p330_p6 = por %p329_p5, %p328_p4 }
   0xe   :  { %p331_p7 = pnand %p330_p6, %p324_p3 }
  0x10   :  { %334 = shalt.err (!%p331_p7)
}
  0x11   :  { %s386_s28 = smov 128   ;;  %s387_s29 = smov 8  }
  0x12   :  { %24 = dma.hbm_to_vmem [thread:$0]  %s487_s0, 256, %s19_s19, [#allocation3], %s386_s28, %s386_s28, %s387_s29  }
  0x13   :  { %s388_s7 = smov [#allocation5]   ;;  %s335_s11 = scalar_lea.hbm %s490_s3, 512 }
  0x14   :  { %s34_s8 = sshll.u32 %s388_s7, 4  ;;  %p336_p8 = scmp.ne.s32.totalorder %s490_s3, %s335_s11  ;;  %s35_s8 = int_to_ptr.vmem [resolvable:$true] %s34_s8 }
  0x15   :  { %p339_p9 = scmp.lt.u32.totalorder %s335_s11, %s490_s3 }
  0x17   :  { %p341_p10 = pnand %p339_p9, %p336_p8 }
  0x19   :  { %344 = shalt.err (!%p341_p10)
}
  0x1a   :  { %s345_s16 = scalar_lea.vmem %s35_s8, 512  ;;  %p350_p12 = scmp.lt.s32.totalorder %s35_s8, %s35_s8 }
  0x1b   :  { %p346_p11 = scmp.ne.s32.totalorder %s35_s8, %s345_s16  ;;  %p351_p13 = scmp.lt.s32.totalorder %s345_s16, %s345_s16 }
  0x1d   :  { %p352_p0 = por %p351_p13, %p350_p12 }
  0x1f   :  { %p353_p1 = pnand %p352_p0, %p346_p11 }
  0x21   :  { %356 = shalt.err (!%p353_p1)
}
  0x22   :  { %40 = dma.hbm_to_vmem [thread:$0]  %s490_s3, 512, %s35_s8, [#allocation6], %s386_s28, %s386_s28, %s387_s29  }
  0x23   :  { %379 = dma.done.wait [#allocation3], 256  }
  0x24   :  { %380 = vsyncadd [#allocation3], 4294967040 }
  0x25   :  { %381 = dma.done.wait [#allocation6], 512  }
  0x26   :  { %382 = vsyncadd [#allocation6], 4294966784  ;;  %v448_v0 = vld [vmem:[#allocation2] sm:$0xff]  ;;  %vm60_vm0 = vcmask 261120   ;;  %v453_v2 = vld [vmem:[#allocation2 + $0x8] sm:$0xff]  ;;  %v69_v7 = vlaneseq  ;;  %vm79_vm1 = vcmask 1041409  }
  0x27   :  { %v271_v1 = vld [vmem:[%s489_s2] ss:$0 sm:$0xff]  ;;  %vm82_vm2 = vcmask 58368   ;;  %v389_v17 = vmov 0   ;;  %v167_v40 = vld [vmem:[#allocation5] sm:$0xff]  ;;  %v168_v41 = vld [vmem:[#allocation5 + $0x8] sm:$0xff] }
  0x28   :  { %v58_v3 = vmul.f32 %v271_v1, %v448_v0  ;;  %v59_v4 = vmul.f32 %v271_v1, %v453_v2  ;;  %v70_v8 = vand.u32 127, %v69_v7  ;;  %v72_v9 = vshrl.u32 %v69_v7, 7  ;;  %306 = vset.pattern.permute.xlu0 %v389_v17  ;;  %305 = vset.pattern.permute.xlu1 %v389_v17  ;;  %v103_v29 = vld [vmem:[%s488_s1] sm:$0x3]  ;;  %v170_v45 = vld [vmem:[#allocation5 + $0x18] sm:$0xff]  ;;  %s393_s21 = smov [#allocation7]  }
  0x29   :  { %v169_v42 = vld [vmem:[#allocation5 + $0x10] sm:$0xff]  ;;  %v390_v43 = vmov 0.0|0.0   ;;  %v291_v44 = vpack.c.bf16 %v168_v41, %v167_v40  ;;  %vm391_vm4 = vmmov 0   ;;  %v392_v46 = vmov 0.0   ;;  %s261_s22 = sshll.u32 %s393_s21, 4  ;;  %s262_s22 = int_to_ptr.vmem [resolvable:$true] %s261_s22 }
  0x2a   :  { %v61_v5 = vsel %vm60_vm0, %v58_v3, 0.0  ;;  %v64_v6 = vsel %vm60_vm0, %v59_v4, 0.0  ;;  %v73_v11 = vsub.s32 %v70_v8, %v72_v9  ;;  %v89_v18 = vsub.s32 0, %v72_v9  ;;  %290 = vmatprep.subr.bf16.mxu0 %v390_v43  ;;  %287 = vmatprep.mubr.msk.f32.mxu0 %vm391_vm4, %v392_v46  ;;  %s357_s23 = scalar_lea.vmem %s262_s22, 32  ;;  %p362_p3 = scmp.lt.s32.totalorder %s262_s22, %s262_s22 }
  0x2b   :  { %62 = vadd.xlane.f32.xlu0 %v61_v5  ;;  %v93_v19 = vsub.s32 1, %v72_v9  ;;  %292 = vmatpush3.bf16.msra.mxu0 %v291_v44  ;;  %v294_v47 = vpack.c.bf16 %v170_v45, %v169_v42  ;;  %v272_v9 = vld [vmem:[%s491_s4] ss:$0 sm:$0xff]  ;;  %p358_p2 = scmp.ne.s32.totalorder %s262_s22, %s357_s23  ;;  %p363_p4 = scmp.lt.s32.totalorder %s357_s23, %s357_s23 }
  0x2c   :  { %293 = vmatprep.subr.bf16.mxu0 %v390_v43 }
  0x2d   :  { %p364_p5 = por %p363_p4, %p362_p3 }
  0x2f   :  { %65 = vadd.xlane.f32.xlu0 %v64_v6  ;;  %295 = vmatpush3.bf16.msra.mxu0 %v294_v47  ;;  %p365_p6 = pnand %p364_p5, %p358_p2 }
  0xb8   :  { %v63_v10 = vpop.xlane.xlu0 %62 }
  0xb9   :  { %v74_v13 = vrot.slane %v63_v10, %v73_v11 }
  0xbc   :  { %v66_v12 = vpop.xlane.xlu0 %65 }
  0xbd   :  { %v78_v14 = vrot.slane %v66_v12, %v73_v11 }
  0xbf   :  { %v80_v15 = vsel %vm79_vm1, %v78_v14, %v74_v13 }
  0xc0   :  { %v83_v16 = vsel %vm82_vm2, %v80_v15, -inf }
  0xc1   :  { %84 = vmax.xlane.f32.xlu1 %v83_v16 }
 0x14e   :  { %v85_v20 = vpop.xlane.xlu1 %84 }
 0x14f   :  { %v90_v21 = vrot.slane %v85_v20, %v89_v18  ;;  %v94_v22 = vrot.slane %v85_v20, %v93_v19 }
 0x151   :  { %v97_v23 = vsub.f32 %v63_v10, %v90_v21  ;;  %v98_v24 = vsub.f32 %v66_v12, %v94_v22 }
 0x153   :  { %v99_v25 = vmul.f32 1.442695, %v97_v23  ;;  %v101_v26 = vmul.f32 1.442695, %v98_v24 }
 0x155   :  { %307 = vpow2.f32 %v99_v25 }
 0x156   :  { %309 = vpow2.f32 %v101_v26 }
 0x15f   :  { %v308_v27 = vpop.eup %307 }
 0x160   :  { %v310_v28 = vpop.eup %309  ;;  %111 = vperm.xlu1 %305, %v308_v27  }
 0x161   :  { %114 = vperm.xlu0 %306, %v310_v28  }
 0x164   :  { %105 = vperm.xlu1 %305, %v103_v29  }
 0x1df   :  { %v112_v30 = vpop.permute.xlu1 %111 }
 0x1e0   :  { %v115_v31 = vpop.permute.xlu0 %114  ;;  %v119_v32 = vrot.slane %v112_v30, %v73_v11 }
 0x1e1   :  { %v123_v33 = vrot.slane %v115_v31, %v73_v11 }
 0x1e3   :  { %v106_v34 = vpop.permute.xlu1 %105  ;;  %v124_v35 = vsel %vm79_vm1, %v123_v33, %v119_v32 }
 0x1e4   :  { %vm107_vm3 = vcmp.lt.s32.totalorder %v70_v8, %v106_v34 }
 0x1e5   :  { %v126_v36 = vsel %vm107_vm3, %v124_v35, 0.0 }
 0x1e6   :  { %v127_v37 = vsel %vm82_vm2, %v126_v36, 0.0  ;;  %v140_v38 = vrot.slane %v126_v36, %v93_v19  ;;  %v133_v39 = vrot.slane %v126_v36, %v89_v18 }
 0x1e7   :  { %128 = vadd.xlane.f32.xlu1 %v127_v37 }
 0x1e8   :  { %142 = vbcast.lane.b32.xlu0 %v140_v38, 256 }
 0x1ec   :  { %135 = vbcast.lane.b32.xlu0 %v133_v39, 256 }
 0x25a   :  { %v143_v48 = vpop.permute.xlu0 %142 }
 0x25b   :  { %v145_v50 = vmul.f32 %v143_v48, %v453_v2 }
 0x25d   :  { %v153_v52 = vsel %vm60_vm0, %v145_v50, 0.0 }
 0x25e   :  { %v136_v49 = vpop.permute.xlu0 %135  ;;  %v154_v54 = vrot.slane %v153_v52, 4 }
 0x25f   :  { %v144_v51 = vmul.f32 %v136_v49, %v448_v0 }
 0x260   :  { %v155_v56 = vadd.f32 %v154_v54, %v153_v52 }
 0x261   :  { %v146_v53 = vsel %vm60_vm0, %v144_v51, 0.0 }
 0x262   :  { %v147_v55 = vrot.slane %v146_v53, 4  ;;  %v156_v58 = vrot.slane %v155_v56, 2 }
 0x264   :  { %v148_v57 = vadd.f32 %v147_v55, %v146_v53  ;;  %v157_v61 = vadd.f32 %v156_v58, %v155_v56 }
 0x266   :  { %v149_v60 = vrot.slane %v148_v57, 2  ;;  %v158_v63 = vrot.slane %v157_v61, 1 }
 0x268   :  { %v150_v62 = vadd.f32 %v149_v60, %v148_v57  ;;  %v159_v2 = vadd.f32 %v158_v63, %v157_v61 }
 0x26a   :  { %v151_v1 = vrot.slane %v150_v62, 1 }
 0x26c   :  { %v152_v0 = vadd.f32 %v151_v1, %v150_v62 }
 0x274   :  { %v129_v59 = vpop.xlane.xlu1 %128 }
 0x275   :  { %311 = vrcp.f32 %v129_v59 }
 0x27f   :  { %v312_v3 = vpop.eup %311 }
 0x280   :  { %v162_v4 = vrot.slane %v312_v3, 1  ;;  %v165_v6 = vmul.f32 %v312_v3, %v152_v0 }
 0x282   :  { %v166_v5 = vmul.f32 %v162_v4, %v159_v2 }
 0x284   :  { %v180_v7 = vrot.slane %v166_v5, 7 }
 0x286   :  { %v181_v8 = vsel %vm79_vm1, %v180_v7, %v165_v6 }
 0x287   :  { %288 = vmatmul.mubr.msk.f32.vlgmr.msra.gmra.mrb[0].mxu0 %vm60_vm0, %v181_v8 }
 0x35a   :  { %v250_v10 = vpop.f32.mrb[0].mxu0 }
 0x35b   :  { %v251_v11 = vadd.f32 %v272_v9, %v250_v10  ;;  %v289_v12 = vpop.f32.mrb[1].mxu0 }
 0x35d   :  { %254 = vst [vmem:[#allocation7] sm:$0x3] %v251_v11 }
 0x35e   :  { %368 = shalt.err (!%p365_p6)
}
 0x35f   :  { %s369_s26 = scalar_lea.hbm %s492_s5, 32 }
 0x360   :  { %p370_p7 = scmp.ne.s32.totalorder %s492_s5, %s369_s26  ;;  %p373_p8 = scmp.lt.u32.totalorder %s369_s26, %s492_s5 }
 0x362   :  { %p375_p9 = pnand %p373_p8, %p370_p7 }
 0x364   :  { %378 = shalt.err (!%p375_p9)
}
 0x365   :  { %264 = dma.vmem_to_hbm [thread:$0]  %s262_s22, 32, %s492_s5, [#allocation4]  }
 0x366   :  { %383 = dma.done.wait [#allocation4], 32  }
 0x367   :  { %384 = vsyncadd [#allocation4], 4294967264 }
 0x368   :  { %268 = vsyncpa [#allocation3], 1 }
 0x369   :  { %269 = vsyncpa [#allocation6], 1 }
 0x36a   :  { %270 = vsyncpa [#allocation4], 1 }

</bundles_post_ra>
